<compile_context>
chip_gen: v7x
topology: tpu7x:2x2x1
jax: 0.10.0
libtpu: 0.0.40
codegen_flags: <defaults>
</compile_context>

<pallas_src>
import jax
import jax.numpy as jnp
from jax.experimental import pallas as pl
from jax.experimental.pallas import tpu as pltpu


def zinb_ae_kernel(
    xT_ref,                               # (in_dim, TB) bf16, feature-major
    w1, b1, w2, b2, w3, b3, w4, b4,       # encoder (weights pre-transposed: (out, in))
    w5, b5, w6, b6, w7, b7, w8, b8,       # decoder
    wh, bh,                               # fused heads [pi | disp | mean]: (3*in_dim, in_dim)
    out_ref,                              # (3*in_dim + z, TB) f32 slab
):
    in_dim = xT_ref.shape[0]

    def layer(h_bf, w_ref, b_ref):
        # Feature-major: (out, k) @ (k, TB) -> (out, TB); bf16 MXU operands,
        # f32 accumulation, f32 bias (bias shape (out, 1) broadcasts over lanes).
        return jnp.dot(w_ref[...], h_bf, preferred_element_type=jnp.float32) + b_ref[...]

    relu = lambda a: jnp.maximum(a, 0.0)
    bf16 = lambda a: a.astype(jnp.bfloat16)

    h = xT_ref[...]                                   # bf16

    # ----- encoder: in -> h1 -> h2 -> h3 -> z (ReLU after every layer) -----
    h = bf16(relu(layer(h, w1, b1)))
    h = bf16(relu(layer(h, w2, b2)))
    h = bf16(relu(layer(h, w3, b3)))
    emb_f32 = relu(layer(h, w4, b4))                  # (z, TB) f32 (returned)
    emb_bf = bf16(emb_f32)

    # ----- decoder: z -> h3 -> h2 -> h1 -> in (ReLU after every layer) -----
    d = bf16(relu(layer(emb_bf, w5, b5)))
    d = bf16(relu(layer(d, w6, b6)))
    d = bf16(relu(layer(d, w7, b7)))
    latent = bf16(relu(layer(d, w8, b8)))             # (in_dim, TB) bf16

    # ----- fused heads: one (3*in_dim, TB) matmul, per-segment activations ---
    heads = layer(latent, wh, bh)                     # (3*in_dim, TB) f32

    pi = jax.nn.sigmoid(jax.nn.sigmoid(heads[:in_dim]))            # Linear->Sigmoid, then extra sigmoid
    disp = jnp.clip(heads[in_dim:2 * in_dim], 0.0001, 10000.0)     # DispAct
    mean = jnp.clip(jnp.exp(heads[2 * in_dim:]), 1e-05, 1000000.0) # MeanAct

    # Single lane-dense slab: sublane-sliced stores (8-aligned rows, full 128-lane width).
    out_ref[0:in_dim, :] = pi.astype(out_ref.dtype)
    out_ref[in_dim:2 * in_dim, :] = disp.astype(out_ref.dtype)
    out_ref[2 * in_dim:3 * in_dim, :] = mean.astype(out_ref.dtype)
    out_ref[3 * in_dim:, :] = emb_f32.astype(out_ref.dtype)


def _choose_batch_tiling(batch: int):
    """Batch tile on the lane axis: multiple of 128, <= 256.

    Prefers an even tile count when >1 tile so v7x megacore sharding has no idle
    tail core; never adds a whole extra padding tile (that would cost a full
    serial iteration on single-TC v5e/v6e).
    """
    pad = -(-batch // 128) * 128
    if pad <= 256:
        return pad, 1
    n256 = -(-pad // 256)
    n128 = -(-pad // 128)
    if n256 % 2 == 0:
        return 256, n256
    if n128 % 2 == 0:
        return 128, n128
    return 256, n256


def zinb_ae_forward(x, scale_factor, params, *, batch_tile=None):
    """x: (B, in_dim) f32, scale_factor: (B,) f32, params: dict of f32 weights/biases.

    Returns (output, pi, disp, mean, emb) matching ZINB_AE.forward.
    If batch_tile is given it must be a multiple of 128.
    """
    B, in_dim = x.shape
    z_dim = params["w4"].shape[1]

    # --- fuse the three head projections into a single matmul -----------------
    wh = jnp.concatenate([params["wp"], params["wd"], params["wm"]], axis=1)   # (in, 3*in)
    bh = jnp.concatenate([params["bp"], params["bd"], params["bm"]], axis=1)   # (1, 3*in)

    # --- pre-transpose weights to feature-major; biases become column vectors -
    layer_pairs = [("w1", "b1"), ("w2", "b2"), ("w3", "b3"), ("w4", "b4"),
                   ("w5", "b5"), ("w6", "b6"), ("w7", "b7"), ("w8", "b8")]
    weight_args = []
    for wn, bn in layer_pairs:
        weight_args.append(params[wn].T.astype(jnp.bfloat16))       # (out, in)
        weight_args.append(params[bn].reshape(-1, 1).astype(jnp.float32))  # (out, 1)
    weight_args.append(wh.T.astype(jnp.bfloat16))                    # (3*in, in)
    weight_args.append(bh.reshape(-1, 1).astype(jnp.float32))        # (3*in, 1)

    # --- batch tiling (batch on the lane axis) ---------------------------------
    if batch_tile is None:
        tb, n_tiles = _choose_batch_tiling(B)
    else:
        tb = int(batch_tile)
        n_tiles = -(-B // tb)
    Bp = n_tiles * tb

    xT = x.T.astype(jnp.bfloat16)                                    # (in_dim, B)
    if Bp != B:
        xT = jnp.pad(xT, ((0, 0), (0, Bp - B)))

    slab_rows = 3 * in_dim + z_dim

    # --- VMEM budget sized to the real footprint (no 32 MiB floor; v7x has 64 MiB)
    wbytes = sum(int(a.size) * a.dtype.itemsize for a in weight_args)
    io_bytes = tb * in_dim * 2 + tb * slab_rows * 4
    vmem_limit = int(min(64 << 20, 2 * wbytes + 2 * io_bytes + (12 << 20)))

    def resident_spec(arr):
        # Constant block index across the grid -> stays VMEM-resident, no re-DMA.
        return pl.BlockSpec(arr.shape, lambda i: (0, 0))

    slab = pl.pallas_call(
        zinb_ae_kernel,
        out_shape=jax.ShapeDtypeStruct((slab_rows, Bp), jnp.float32),
        grid_spec=pltpu.PrefetchScalarGridSpec(
            num_scalar_prefetch=0,
            grid=(n_tiles,),
            in_specs=[pl.BlockSpec((in_dim, tb), lambda i: (0, i))]
                     + [resident_spec(a) for a in weight_args],
            out_specs=pl.BlockSpec((slab_rows, tb), lambda i: (0, i)),
        ),
        compiler_params=pltpu.CompilerParams(
            dimension_semantics=("parallel",),
            vmem_limit_bytes=vmem_limit,
        ),
    )(xT, *weight_args)

    slab = slab[:, :B]
    pi = slab[:in_dim].T
    disp = slab[in_dim:2 * in_dim].T
    mean = slab[2 * in_dim:3 * in_dim].T
    emb = slab[3 * in_dim:].T
    # output = mean * scale_factor : pure rescale, fused by XLA outside the kernel
    output = mean * scale_factor.reshape(B, 1).astype(mean.dtype)
    return output, pi, disp, mean, emb


def init_params(key, in_dim, h1, h2, h3, z):
    """Deterministic synthetic weights (small scale so exp() stays reasonable)."""
    dims = [
        ("w1", (in_dim, h1)), ("b1", (1, h1)),
        ("w2", (h1, h2)),     ("b2", (1, h2)),
        ("w3", (h2, h3)),     ("b3", (1, h3)),
        ("w4", (h3, z)),      ("b4", (1, z)),
        ("w5", (z, h3)),      ("b5", (1, h3)),
        ("w6", (h3, h2)),     ("b6", (1, h2)),
        ("w7", (h2, h1)),     ("b7", (1, h1)),
        ("w8", (h1, in_dim)), ("b8", (1, in_dim)),
        ("wp", (in_dim, in_dim)), ("bp", (1, in_dim)),
        ("wd", (in_dim, in_dim)), ("bd", (1, in_dim)),
        ("wm", (in_dim, in_dim)), ("bm", (1, in_dim)),
    ]
    params = {}
    keys = jax.random.split(key, len(dims))
    for k_sub, (name, shape) in zip(keys, dims):
        if name.startswith("w"):
            params[name] = 0.1 * jax.random.normal(k_sub, shape, dtype=jnp.float32)
        else:
            params[name] = 0.01 * jax.random.normal(k_sub, shape, dtype=jnp.float32)
    return params


if __name__ == "__main__":
    # ZINB_AE(in_dim=64, hidden1=32, hidden2=32, hidden3=32, z_emb_size=16, dropout_rate=0.0)
    B, in_dim, h1, h2, h3, z = 8, 64, 32, 32, 32, 16

    key = jax.random.PRNGKey(0)
    kx, ksf, kp = jax.random.split(key, 3)
    x = jax.random.normal(kx, (B, in_dim), dtype=jnp.float32)
    scale_factor = jax.random.uniform(ksf, (B,), dtype=jnp.float32, minval=0.5, maxval=2.0)
    params = init_params(kp, in_dim, h1, h2, h3, z)

    outs = zinb_ae_forward(x, scale_factor, params)
    jax.block_until_ready(outs)
    output, pi, disp, mean, emb = outs

    # reference (mirrors the kernel's bf16 operands / bf16 inter-layer carry, f32 accumulate)
    def ref(x, sf, p):
        r = lambda a: a.astype(jnp.bfloat16).astype(jnp.float32)
        relu = lambda a: jnp.maximum(a, 0.0)
        lin = lambda hbf, w, b: hbf @ r(w) + b
        h = r(x)
        h = r(relu(lin(h, p["w1"], p["b1"])))
        h = r(relu(lin(h, p["w2"], p["b2"])))
        h = r(relu(lin(h, p["w3"], p["b3"])))
        e = relu(lin(h, p["w4"], p["b4"]))
        d = r(e)
        d = r(relu(lin(d, p["w5"], p["b5"])))
        d = r(relu(lin(d, p["w6"], p["b6"])))
        d = r(relu(lin(d, p["w7"], p["b7"])))
        lat = r(relu(lin(d, p["w8"], p["b8"])))
        pi_r = jax.nn.sigmoid(jax.nn.sigmoid(lin(lat, p["wp"], p["bp"])))
        di_r = jnp.clip(lin(lat, p["wd"], p["bd"]), 1e-4, 1e4)
        me_r = jnp.clip(jnp.exp(lin(lat, p["wm"], p["bm"])), 1e-5, 1e6)
        return me_r * sf[:, None], pi_r, di_r, me_r, e

    refs = ref(x, scale_factor, params)
    names = ("output", "pi", "disp", "mean", "emb")
    for name, got, want in zip(names, (output, pi, disp, mean, emb), refs):
        assert jnp.allclose(got, want, rtol=2e-3, atol=2e-3), f"mismatch vs reference: {name}"

    print("KERNEL_OK")
</pallas_src>

<mosaic_0001>
module attributes {stable_mosaic.version = 11 : i64} {
  func.func @zinb_ae_kernel(%arg0: i32, %arg1: memref<64x128xbf16, #tpu.memory_space<vmem>>, %arg2: memref<32x64xbf16, #tpu.memory_space<vmem>>, %arg3: memref<32x1xf32, #tpu.memory_space<vmem>>, %arg4: memref<32x32xbf16, #tpu.memory_space<vmem>>, %arg5: memref<32x1xf32, #tpu.memory_space<vmem>>, %arg6: memref<32x32xbf16, #tpu.memory_space<vmem>>, %arg7: memref<32x1xf32, #tpu.memory_space<vmem>>, %arg8: memref<16x32xbf16, #tpu.memory_space<vmem>>, %arg9: memref<16x1xf32, #tpu.memory_space<vmem>>, %arg10: memref<32x16xbf16, #tpu.memory_space<vmem>>, %arg11: memref<32x1xf32, #tpu.memory_space<vmem>>, %arg12: memref<32x32xbf16, #tpu.memory_space<vmem>>, %arg13: memref<32x1xf32, #tpu.memory_space<vmem>>, %arg14: memref<32x32xbf16, #tpu.memory_space<vmem>>, %arg15: memref<32x1xf32, #tpu.memory_space<vmem>>, %arg16: memref<64x32xbf16, #tpu.memory_space<vmem>>, %arg17: memref<64x1xf32, #tpu.memory_space<vmem>>, %arg18: memref<192x64xbf16, #tpu.memory_space<vmem>>, %arg19: memref<192x1xf32, #tpu.memory_space<vmem>>, %arg20: memref<208x128xf32, #tpu.memory_space<vmem>>) attributes {dimension_semantics = [#tpu.dimension_semantics<parallel>], iteration_bounds = array<i64: 1>, scalar_prefetch = 0 : i64, scratch_operands = 0 : i64, tpu.core_type = #tpu.core_type<tc>, window_params = [{transform_indices = @transform_0, window_bounds = array<i64: 64, 128>}, {pipeline_mode = #tpu.pipeline_mode<synchronous>, transform_indices = @transform_1, window_bounds = array<i64: 32, 64>}, {pipeline_mode = #tpu.pipeline_mode<synchronous>, transform_indices = @transform_2, window_bounds = array<i64: 32, 1>}, {pipeline_mode = #tpu.pipeline_mode<synchronous>, transform_indices = @transform_3, window_bounds = array<i64: 32, 32>}, {pipeline_mode = #tpu.pipeline_mode<synchronous>, transform_indices = @transform_4, window_bounds = array<i64: 32, 1>}, {pipeline_mode = #tpu.pipeline_mode<synchronous>, transform_indices = @transform_5, window_bounds = array<i64: 32, 32>}, {pipeline_mode = #tpu.pipeline_mode<synchronous>, transform_indices = @transform_6, window_bounds = array<i64: 32, 1>}, {pipeline_mode = #tpu.pipeline_mode<synchronous>, transform_indices = @transform_7, window_bounds = array<i64: 16, 32>}, {pipeline_mode = #tpu.pipeline_mode<synchronous>, transform_indices = @transform_8, window_bounds = array<i64: 16, 1>}, {pipeline_mode = #tpu.pipeline_mode<synchronous>, transform_indices = @transform_9, window_bounds = array<i64: 32, 16>}, {pipeline_mode = #tpu.pipeline_mode<synchronous>, transform_indices = @transform_10, window_bounds = array<i64: 32, 1>}, {pipeline_mode = #tpu.pipeline_mode<synchronous>, transform_indices = @transform_11, window_bounds = array<i64: 32, 32>}, {pipeline_mode = #tpu.pipeline_mode<synchronous>, transform_indices = @transform_12, window_bounds = array<i64: 32, 1>}, {pipeline_mode = #tpu.pipeline_mode<synchronous>, transform_indices = @transform_13, window_bounds = array<i64: 32, 32>}, {pipeline_mode = #tpu.pipeline_mode<synchronous>, transform_indices = @transform_14, window_bounds = array<i64: 32, 1>}, {pipeline_mode = #tpu.pipeline_mode<synchronous>, transform_indices = @transform_15, window_bounds = array<i64: 64, 32>}, {pipeline_mode = #tpu.pipeline_mode<synchronous>, transform_indices = @transform_16, window_bounds = array<i64: 64, 1>}, {pipeline_mode = #tpu.pipeline_mode<synchronous>, transform_indices = @transform_17, window_bounds = array<i64: 192, 64>}, {pipeline_mode = #tpu.pipeline_mode<synchronous>, transform_indices = @transform_18, window_bounds = array<i64: 192, 1>}, {transform_indices = @transform_19, window_bounds = array<i64: 208, 128>}]} {
    %c0 = arith.constant 0 : index
    %c0_0 = arith.constant 0 : index
    %0 = vector.load %arg1[%c0, %c0_0] : memref<64x128xbf16, #tpu.memory_space<vmem>>, vector<64x128xbf16>
    %c0_1 = arith.constant 0 : index
    %c0_2 = arith.constant 0 : index
    %1 = vector.load %arg2[%c0_1, %c0_2] : memref<32x64xbf16, #tpu.memory_space<vmem>>, vector<32x64xbf16>
    %cst = arith.constant dense<0.000000e+00> : vector<32x128xf32>
    %2 = tpu.matmul %1, %0, %cst {dimension_numbers = #tpu.dot_dimension_numbers<[1], [0], [0], [1], [0, 0, 1, 1], [], []>} : vector<32x64xbf16>, vector<64x128xbf16>, vector<32x128xf32> -> vector<32x128xf32>
    %c0_3 = arith.constant 0 : index
    %c0_4 = arith.constant 0 : index
    %3 = vector.load %arg3[%c0_3, %c0_4] : memref<32x1xf32, #tpu.memory_space<vmem>>, vector<32x1xf32>
    %4 = vector.broadcast %3 : vector<32x1xf32> to vector<32x128xf32>
    %5 = arith.addf %2, %4 : vector<32x128xf32>
    %cst_5 = arith.constant 0.000000e+00 : f32
    %6 = vector.broadcast %cst_5 : f32 to vector<32x128xf32>
    %7 = arith.maximumf %5, %6 : vector<32x128xf32>
    %8 = arith.truncf %7 : vector<32x128xf32> to vector<32x128xbf16>
    %c0_6 = arith.constant 0 : index
    %c0_7 = arith.constant 0 : index
    %9 = vector.load %arg4[%c0_6, %c0_7] : memref<32x32xbf16, #tpu.memory_space<vmem>>, vector<32x32xbf16>
    %cst_8 = arith.constant dense<0.000000e+00> : vector<32x128xf32>
    %10 = tpu.matmul %9, %8, %cst_8 {dimension_numbers = #tpu.dot_dimension_numbers<[1], [0], [0], [1], [0, 0, 1, 1], [], []>} : vector<32x32xbf16>, vector<32x128xbf16>, vector<32x128xf32> -> vector<32x128xf32>
    %c0_9 = arith.constant 0 : index
    %c0_10 = arith.constant 0 : index
    %11 = vector.load %arg5[%c0_9, %c0_10] : memref<32x1xf32, #tpu.memory_space<vmem>>, vector<32x1xf32>
    %12 = vector.broadcast %11 : vector<32x1xf32> to vector<32x128xf32>
    %13 = arith.addf %10, %12 : vector<32x128xf32>
    %cst_11 = arith.constant 0.000000e+00 : f32
    %14 = vector.broadcast %cst_11 : f32 to vector<32x128xf32>
    %15 = arith.maximumf %13, %14 : vector<32x128xf32>
    %16 = arith.truncf %15 : vector<32x128xf32> to vector<32x128xbf16>
    %c0_12 = arith.constant 0 : index
    %c0_13 = arith.constant 0 : index
    %17 = vector.load %arg6[%c0_12, %c0_13] : memref<32x32xbf16, #tpu.memory_space<vmem>>, vector<32x32xbf16>
    %cst_14 = arith.constant dense<0.000000e+00> : vector<32x128xf32>
    %18 = tpu.matmul %17, %16, %cst_14 {dimension_numbers = #tpu.dot_dimension_numbers<[1], [0], [0], [1], [0, 0, 1, 1], [], []>} : vector<32x32xbf16>, vector<32x128xbf16>, vector<32x128xf32> -> vector<32x128xf32>
    %c0_15 = arith.constant 0 : index
    %c0_16 = arith.constant 0 : index
    %19 = vector.load %arg7[%c0_15, %c0_16] : memref<32x1xf32, #tpu.memory_space<vmem>>, vector<32x1xf32>
    %20 = vector.broadcast %19 : vector<32x1xf32> to vector<32x128xf32>
    %21 = arith.addf %18, %20 : vector<32x128xf32>
    %cst_17 = arith.constant 0.000000e+00 : f32
    %22 = vector.broadcast %cst_17 : f32 to vector<32x128xf32>
    %23 = arith.maximumf %21, %22 : vector<32x128xf32>
    %24 = arith.truncf %23 : vector<32x128xf32> to vector<32x128xbf16>
    %c0_18 = arith.constant 0 : index
    %c0_19 = arith.constant 0 : index
    %25 = vector.load %arg8[%c0_18, %c0_19] : memref<16x32xbf16, #tpu.memory_space<vmem>>, vector<16x32xbf16>
    %cst_20 = arith.constant dense<0.000000e+00> : vector<16x128xf32>
    %26 = tpu.matmul %25, %24, %cst_20 {dimension_numbers = #tpu.dot_dimension_numbers<[1], [0], [0], [1], [0, 0, 1, 1], [], []>} : vector<16x32xbf16>, vector<32x128xbf16>, vector<16x128xf32> -> vector<16x128xf32>
    %c0_21 = arith.constant 0 : index
    %c0_22 = arith.constant 0 : index
    %27 = vector.load %arg9[%c0_21, %c0_22] : memref<16x1xf32, #tpu.memory_space<vmem>>, vector<16x1xf32>
    %28 = vector.broadcast %27 : vector<16x1xf32> to vector<16x128xf32>
    %29 = arith.addf %26, %28 : vector<16x128xf32>
    %cst_23 = arith.constant 0.000000e+00 : f32
    %30 = vector.broadcast %cst_23 : f32 to vector<16x128xf32>
    %31 = arith.maximumf %29, %30 : vector<16x128xf32>
    %32 = arith.truncf %31 : vector<16x128xf32> to vector<16x128xbf16>
    %c0_24 = arith.constant 0 : index
    %c0_25 = arith.constant 0 : index
    %33 = vector.load %arg10[%c0_24, %c0_25] : memref<32x16xbf16, #tpu.memory_space<vmem>>, vector<32x16xbf16>
    %cst_26 = arith.constant dense<0.000000e+00> : vector<32x128xf32>
    %34 = tpu.matmul %33, %32, %cst_26 {dimension_numbers = #tpu.dot_dimension_numbers<[1], [0], [0], [1], [0, 0, 1, 1], [], []>} : vector<32x16xbf16>, vector<16x128xbf16>, vector<32x128xf32> -> vector<32x128xf32>
    %c0_27 = arith.constant 0 : index
    %c0_28 = arith.constant 0 : index
    %35 = vector.load %arg11[%c0_27, %c0_28] : memref<32x1xf32, #tpu.memory_space<vmem>>, vector<32x1xf32>
    %36 = vector.broadcast %35 : vector<32x1xf32> to vector<32x128xf32>
    %37 = arith.addf %34, %36 : vector<32x128xf32>
    %cst_29 = arith.constant 0.000000e+00 : f32
    %38 = vector.broadcast %cst_29 : f32 to vector<32x128xf32>
    %39 = arith.maximumf %37, %38 : vector<32x128xf32>
    %40 = arith.truncf %39 : vector<32x128xf32> to vector<32x128xbf16>
    %c0_30 = arith.constant 0 : index
    %c0_31 = arith.constant 0 : index
    %41 = vector.load %arg12[%c0_30, %c0_31] : memref<32x32xbf16, #tpu.memory_space<vmem>>, vector<32x32xbf16>
    %cst_32 = arith.constant dense<0.000000e+00> : vector<32x128xf32>
    %42 = tpu.matmul %41, %40, %cst_32 {dimension_numbers = #tpu.dot_dimension_numbers<[1], [0], [0], [1], [0, 0, 1, 1], [], []>} : vector<32x32xbf16>, vector<32x128xbf16>, vector<32x128xf32> -> vector<32x128xf32>
    %c0_33 = arith.constant 0 : index
    %c0_34 = arith.constant 0 : index
    %43 = vector.load %arg13[%c0_33, %c0_34] : memref<32x1xf32, #tpu.memory_space<vmem>>, vector<32x1xf32>
    %44 = vector.broadcast %43 : vector<32x1xf32> to vector<32x128xf32>
    %45 = arith.addf %42, %44 : vector<32x128xf32>
    %cst_35 = arith.constant 0.000000e+00 : f32
    %46 = vector.broadcast %cst_35 : f32 to vector<32x128xf32>
    %47 = arith.maximumf %45, %46 : vector<32x128xf32>
    %48 = arith.truncf %47 : vector<32x128xf32> to vector<32x128xbf16>
    %c0_36 = arith.constant 0 : index
    %c0_37 = arith.constant 0 : index
    %49 = vector.load %arg14[%c0_36, %c0_37] : memref<32x32xbf16, #tpu.memory_space<vmem>>, vector<32x32xbf16>
    %cst_38 = arith.constant dense<0.000000e+00> : vector<32x128xf32>
    %50 = tpu.matmul %49, %48, %cst_38 {dimension_numbers = #tpu.dot_dimension_numbers<[1], [0], [0], [1], [0, 0, 1, 1], [], []>} : vector<32x32xbf16>, vector<32x128xbf16>, vector<32x128xf32> -> vector<32x128xf32>
    %c0_39 = arith.constant 0 : index
    %c0_40 = arith.constant 0 : index
    %51 = vector.load %arg15[%c0_39, %c0_40] : memref<32x1xf32, #tpu.memory_space<vmem>>, vector<32x1xf32>
    %52 = vector.broadcast %51 : vector<32x1xf32> to vector<32x128xf32>
    %53 = arith.addf %50, %52 : vector<32x128xf32>
    %cst_41 = arith.constant 0.000000e+00 : f32
    %54 = vector.broadcast %cst_41 : f32 to vector<32x128xf32>
    %55 = arith.maximumf %53, %54 : vector<32x128xf32>
    %56 = arith.truncf %55 : vector<32x128xf32> to vector<32x128xbf16>
    %c0_42 = arith.constant 0 : index
    %c0_43 = arith.constant 0 : index
    %57 = vector.load %arg16[%c0_42, %c0_43] : memref<64x32xbf16, #tpu.memory_space<vmem>>, vector<64x32xbf16>
    %cst_44 = arith.constant dense<0.000000e+00> : vector<64x128xf32>
    %58 = tpu.matmul %57, %56, %cst_44 {dimension_numbers = #tpu.dot_dimension_numbers<[1], [0], [0], [1], [0, 0, 1, 1], [], []>} : vector<64x32xbf16>, vector<32x128xbf16>, vector<64x128xf32> -> vector<64x128xf32>
    %c0_45 = arith.constant 0 : index
    %c0_46 = arith.constant 0 : index
    %59 = vector.load %arg17[%c0_45, %c0_46] : memref<64x1xf32, #tpu.memory_space<vmem>>, vector<64x1xf32>
    %60 = vector.broadcast %59 : vector<64x1xf32> to vector<64x128xf32>
    %61 = arith.addf %58, %60 : vector<64x128xf32>
    %cst_47 = arith.constant 0.000000e+00 : f32
    %62 = vector.broadcast %cst_47 : f32 to vector<64x128xf32>
    %63 = arith.maximumf %61, %62 : vector<64x128xf32>
    %64 = arith.truncf %63 : vector<64x128xf32> to vector<64x128xbf16>
    %c0_48 = arith.constant 0 : index
    %c0_49 = arith.constant 0 : index
    %65 = vector.load %arg18[%c0_48, %c0_49] : memref<192x64xbf16, #tpu.memory_space<vmem>>, vector<192x64xbf16>
    %cst_50 = arith.constant dense<0.000000e+00> : vector<192x128xf32>
    %66 = tpu.matmul %65, %64, %cst_50 {dimension_numbers = #tpu.dot_dimension_numbers<[1], [0], [0], [1], [0, 0, 1, 1], [], []>} : vector<192x64xbf16>, vector<64x128xbf16>, vector<192x128xf32> -> vector<192x128xf32>
    %c0_51 = arith.constant 0 : index
    %c0_52 = arith.constant 0 : index
    %67 = vector.load %arg19[%c0_51, %c0_52] : memref<192x1xf32, #tpu.memory_space<vmem>>, vector<192x1xf32>
    %68 = vector.broadcast %67 : vector<192x1xf32> to vector<192x128xf32>
    %69 = arith.addf %66, %68 : vector<192x128xf32>
    %70 = vector.extract_strided_slice %69 {offsets = [0, 0], sizes = [64, 128], strides = [1, 1]} : vector<192x128xf32> to vector<64x128xf32>
    %71 = arith.negf %70 : vector<64x128xf32>
    %72 = math.exp %71 : vector<64x128xf32>
    %cst_53 = arith.constant 1.000000e+00 : f32
    %73 = vector.broadcast %cst_53 : f32 to vector<64x128xf32>
    %74 = arith.addf %73, %72 : vector<64x128xf32>
    %75 = arith.divf %73, %74 : vector<64x128xf32>
    %76 = arith.negf %75 : vector<64x128xf32>
    %77 = math.exp %76 : vector<64x128xf32>
    %cst_54 = arith.constant 1.000000e+00 : f32
    %78 = vector.broadcast %cst_54 : f32 to vector<64x128xf32>
    %79 = arith.addf %78, %77 : vector<64x128xf32>
    %80 = arith.divf %78, %79 : vector<64x128xf32>
    %81 = vector.extract_strided_slice %69 {offsets = [64, 0], sizes = [64, 128], strides = [1, 1]} : vector<192x128xf32> to vector<64x128xf32>
    %cst_55 = arith.constant 9.99999974E-5 : f32
    %cst_56 = arith.constant 1.000000e+04 : f32
    %82 = vector.broadcast %cst_55 : f32 to vector<64x128xf32>
    %83 = arith.maximumf %82, %81 : vector<64x128xf32>
    %84 = vector.broadcast %cst_56 : f32 to vector<64x128xf32>
    %85 = arith.minimumf %84, %83 : vector<64x128xf32>
    %86 = vector.extract_strided_slice %69 {offsets = [128, 0], sizes = [64, 128], strides = [1, 1]} : vector<192x128xf32> to vector<64x128xf32>
    %87 = math.exp %86 : vector<64x128xf32>
    %cst_57 = arith.constant 9.99999974E-6 : f32
    %cst_58 = arith.constant 1.000000e+06 : f32
    %88 = vector.broadcast %cst_57 : f32 to vector<64x128xf32>
    %89 = arith.maximumf %88, %87 : vector<64x128xf32>
    %90 = vector.broadcast %cst_58 : f32 to vector<64x128xf32>
    %91 = arith.minimumf %90, %89 : vector<64x128xf32>
    %c0_59 = arith.constant 0 : index
    %c0_60 = arith.constant 0 : index
    %92 = vector.load %arg20[%c0_59, %c0_60] : memref<208x128xf32, #tpu.memory_space<vmem>>, vector<64x128xf32>
    tpu.vector_store %arg20[%c0_59, %c0_60], %80 {strides = array<i32>} : memref<208x128xf32, #tpu.memory_space<vmem>>, vector<64x128xf32>,
    %c64 = arith.constant 64 : index
    %c0_61 = arith.constant 0 : index
    %93 = vector.load %arg20[%c64, %c0_61] : memref<208x128xf32, #tpu.memory_space<vmem>>, vector<64x128xf32>
    tpu.vector_store %arg20[%c64, %c0_61], %85 {strides = array<i32>} : memref<208x128xf32, #tpu.memory_space<vmem>>, vector<64x128xf32>,
    %c128 = arith.constant 128 : index
    %c0_62 = arith.constant 0 : index
    %94 = vector.load %arg20[%c128, %c0_62] : memref<208x128xf32, #tpu.memory_space<vmem>>, vector<64x128xf32>
    tpu.vector_store %arg20[%c128, %c0_62], %91 {strides = array<i32>} : memref<208x128xf32, #tpu.memory_space<vmem>>, vector<64x128xf32>,
    %c192 = arith.constant 192 : index
    %c0_63 = arith.constant 0 : index
    %95 = vector.load %arg20[%c192, %c0_63] : memref<208x128xf32, #tpu.memory_space<vmem>>, vector<16x128xf32>
    tpu.vector_store %arg20[%c192, %c0_63], %31 {strides = array<i32>} : memref<208x128xf32, #tpu.memory_space<vmem>>, vector<16x128xf32>,
    return
  }
  func.func @transform_0(%arg0: i32) -> (i32, i32) {
    %c0_i32 = arith.constant 0 : i32
    %c0_i32_0 = arith.constant 0 : i32
    return %c0_i32, %arg0 : i32, i32
  }
  func.func @transform_1(%arg0: i32) -> (i32, i32) {
    %c0_i32 = arith.constant 0 : i32
    %c0_i32_0 = arith.constant 0 : i32
    %c0_i32_1 = arith.constant 0 : i32
    return %c0_i32, %c0_i32_0 : i32, i32
  }
  func.func @transform_2(%arg0: i32) -> (i32, i32) {
    %c0_i32 = arith.constant 0 : i32
    %c0_i32_0 = arith.constant 0 : i32
    %c0_i32_1 = arith.constant 0 : i32
    return %c0_i32, %c0_i32_0 : i32, i32
  }
  func.func @transform_3(%arg0: i32) -> (i32, i32) {
    %c0_i32 = arith.constant 0 : i32
    %c0_i32_0 = arith.constant 0 : i32
    %c0_i32_1 = arith.constant 0 : i32
    return %c0_i32, %c0_i32_0 : i32, i32
  }
  func.func @transform_4(%arg0: i32) -> (i32, i32) {
    %c0_i32 = arith.constant 0 : i32
    %c0_i32_0 = arith.constant 0 : i32
    %c0_i32_1 = arith.constant 0 : i32
    return %c0_i32, %c0_i32_0 : i32, i32
  }
  func.func @transform_5(%arg0: i32) -> (i32, i32) {
    %c0_i32 = arith.constant 0 : i32
    %c0_i32_0 = arith.constant 0 : i32
    %c0_i32_1 = arith.constant 0 : i32
    return %c0_i32, %c0_i32_0 : i32, i32
  }
  func.func @transform_6(%arg0: i32) -> (i32, i32) {
    %c0_i32 = arith.constant 0 : i32
    %c0_i32_0 = arith.constant 0 : i32
    %c0_i32_1 = arith.constant 0 : i32
    return %c0_i32, %c0_i32_0 : i32, i32
  }
  func.func @transform_7(%arg0: i32) -> (i32, i32) {
    %c0_i32 = arith.constant 0 : i32
    %c0_i32_0 = arith.constant 0 : i32
    %c0_i32_1 = arith.constant 0 : i32
    return %c0_i32, %c0_i32_0 : i32, i32
  }
  func.func @transform_8(%arg0: i32) -> (i32, i32) {
    %c0_i32 = arith.constant 0 : i32
    %c0_i32_0 = arith.constant 0 : i32
    %c0_i32_1 = arith.constant 0 : i32
    return %c0_i32, %c0_i32_0 : i32, i32
  }
  func.func @transform_9(%arg0: i32) -> (i32, i32) {
    %c0_i32 = arith.constant 0 : i32
    %c0_i32_0 = arith.constant 0 : i32
    %c0_i32_1 = arith.constant 0 : i32
    return %c0_i32, %c0_i32_0 : i32, i32
  }
  func.func @transform_10(%arg0: i32) -> (i32, i32) {
    %c0_i32 = arith.constant 0 : i32
    %c0_i32_0 = arith.constant 0 : i32
    %c0_i32_1 = arith.constant 0 : i32
    return %c0_i32, %c0_i32_0 : i32, i32
  }
  func.func @transform_11(%arg0: i32) -> (i32, i32) {
    %c0_i32 = arith.constant 0 : i32
    %c0_i32_0 = arith.constant 0 : i32
    %c0_i32_1 = arith.constant 0 : i32
    return %c0_i32, %c0_i32_0 : i32, i32
  }
  func.func @transform_12(%arg0: i32) -> (i32, i32) {
    %c0_i32 = arith.constant 0 : i32
    %c0_i32_0 = arith.constant 0 : i32
    %c0_i32_1 = arith.constant 0 : i32
    return %c0_i32, %c0_i32_0 : i32, i32
  }
  func.func @transform_13(%arg0: i32) -> (i32, i32) {
    %c0_i32 = arith.constant 0 : i32
    %c0_i32_0 = arith.constant 0 : i32
    %c0_i32_1 = arith.constant 0 : i32
    return %c0_i32, %c0_i32_0 : i32, i32
  }
  func.func @transform_14(%arg0: i32) -> (i32, i32) {
    %c0_i32 = arith.constant 0 : i32
    %c0_i32_0 = arith.constant 0 : i32
    %c0_i32_1 = arith.constant 0 : i32
    return %c0_i32, %c0_i32_0 : i32, i32
  }
  func.func @transform_15(%arg0: i32) -> (i32, i32) {
    %c0_i32 = arith.constant 0 : i32
    %c0_i32_0 = arith.constant 0 : i32
    %c0_i32_1 = arith.constant 0 : i32
    return %c0_i32, %c0_i32_0 : i32, i32
  }
  func.func @transform_16(%arg0: i32) -> (i32, i32) {
    %c0_i32 = arith.constant 0 : i32
    %c0_i32_0 = arith.constant 0 : i32
    %c0_i32_1 = arith.constant 0 : i32
    return %c0_i32, %c0_i32_0 : i32, i32
  }
  func.func @transform_17(%arg0: i32) -> (i32, i32) {
    %c0_i32 = arith.constant 0 : i32
    %c0_i32_0 = arith.constant 0 : i32
    %c0_i32_1 = arith.constant 0 : i32
    return %c0_i32, %c0_i32_0 : i32, i32
  }
  func.func @transform_18(%arg0: i32) -> (i32, i32) {
    %c0_i32 = arith.constant 0 : i32
    %c0_i32_0 = arith.constant 0 : i32
    %c0_i32_1 = arith.constant 0 : i32
    return %c0_i32, %c0_i32_0 : i32, i32
  }
  func.func @transform_19(%arg0: i32) -> (i32, i32) {
    %c0_i32 = arith.constant 0 : i32
    %c0_i32_0 = arith.constant 0 : i32
    return %c0_i32, %arg0 : i32, i32
  }
}

</mosaic_0001>

<bundles_post_ra>
// kernel: tpu_custom_call.1
= control target key start
LH: loop header
LB: loop body
LE: loop exit
PB: predicated region body
PF: predicated region fallthrough
CT: control target
= control target key end

     0   :  { %s2336_s0 = inlined_call_operand.vmem [shape: bf16[64,128], index: 0, kind: input, shape index: {}]   ;;  %s2337_s1 = inlined_call_operand.vmem [shape: bf16[32,64], index: 1, kind: input, shape index: {}]   ;;  %s2338_s2 = inlined_call_operand.vmem [shape: f32[32,1], index: 2, kind: input, shape index: {}]   ;;  %s2339_s3 = inlined_call_operand.vmem [shape: bf16[32,32], index: 3, kind: input, shape index: {}]   ;;  %s2340_s4 = inlined_call_operand.vmem [shape: f32[32,1], index: 4, kind: input, shape index: {}]   ;;  %s2341_s5 = inlined_call_operand.vmem [shape: bf16[32,32], index: 5, kind: input, shape index: {}]   ;;  %s2342_s6 = inlined_call_operand.vmem [shape: f32[32,1], index: 6, kind: input, shape index: {}]   ;;  %s2343_s7 = inlined_call_operand.vmem [shape: bf16[16,32], index: 7, kind: input, shape index: {}]   ;;  %s2344_s8 = inlined_call_operand.vmem [shape: f32[16,1], index: 8, kind: input, shape index: {}]   ;;  %s2345_s9 = inlined_call_operand.vmem [shape: bf16[32,16], index: 9, kind: input, shape index: {}]   ;;  %s2346_s10 = inlined_call_operand.vmem [shape: f32[32,1], index: 10, kind: input, shape index: {}]   ;;  %s2347_s11 = inlined_call_operand.vmem [shape: bf16[32,32], index: 11, kind: input, shape index: {}]   ;;  %s2348_s12 = inlined_call_operand.vmem [shape: f32[32,1], index: 12, kind: input, shape index: {}]   ;;  %s2349_s13 = inlined_call_operand.vmem [shape: bf16[32,32], index: 13, kind: input, shape index: {}]   ;;  %s2350_s14 = inlined_call_operand.vmem [shape: f32[32,1], index: 14, kind: input, shape index: {}]   ;;  %s2351_s15 = inlined_call_operand.vmem [shape: bf16[64,32], index: 15, kind: input, shape index: {}]   ;;  %s2352_s16 = inlined_call_operand.vmem [shape: f32[64,1], index: 16, kind: input, shape index: {}]   ;;  %s2353_s17 = inlined_call_operand.vmem [shape: bf16[192,64], index: 17, kind: input, shape index: {}]   ;;  %s2354_s18 = inlined_call_operand.vmem [shape: f32[192,1], index: 18, kind: input, shape index: {}]   ;;  %s2355_s19 = inlined_call_operand.hbm [shape: f32[208,128], index: 19, kind: output, shape index: {}]  }
   0x1   :  { %2360 = sst [smem:[#allocation5_spill]] %s2336_s0 }
   0x2   :  { %2361 = sst [smem:[#allocation6_spill]] %s2337_s1 }
   0x3   :  { %2362 = sst [smem:[#allocation7_spill]] %s2338_s2 }
   0x4   :  { %2363 = sst [smem:[#allocation8_spill]] %s2339_s3 }
   0x5   :  { %s2364_s20 = sld [smem:[#allocation7_spill]]  ;;  %v1886_v2 = vmov 0   ;;  %s2365_s23 = sld [smem:[#allocation5_spill]]  ;;  %v201_v8 = vld [vmem:[%s2340_s4 + $0x8] sm:$0xff]  ;;  %v200_v9 = vld [vmem:[%s2340_s4] sm:$0xff]  ;;  %vm134_vm0 = vcmask 523264  }
   0x6   :  { %1748 = vset.pattern.permute.xlu1 %v1886_v2  ;;  %1747 = vset.pattern.permute.xlu0 %v1886_v2  ;;  %s2366_s24 = sld [smem:[#allocation6_spill]]  ;;  %v203_v12 = vld [vmem:[%s2340_s4 + $0x18] sm:$0xff]  ;;  %v202_v13 = vld [vmem:[%s2340_s4 + $0x10] sm:$0xff]  ;;  %v301_v14 = vld [vmem:[%s2342_s6 + $0x8] sm:$0xff] }
   0x7   :  { %v300_v15 = vld [vmem:[%s2342_s6] sm:$0xff]  ;;  %v303_v17 = vld [vmem:[%s2342_s6 + $0x18] sm:$0xff]  ;;  %v302_v18 = vld [vmem:[%s2342_s6 + $0x10] sm:$0xff] }
   0x8   :  { %v398_v19 = vld [vmem:[%s2344_s8 + $0x8] sm:$0xff]  ;;  %v397_v20 = vld [vmem:[%s2344_s8] sm:$0xff]  ;;  %v468_v23 = vld [vmem:[%s2346_s10 + $0x18] sm:$0xff] }
   0x9   :  { %v466_v21 = vld [vmem:[%s2346_s10 + $0x8] sm:$0xff]  ;;  %v465_v22 = vld [vmem:[%s2346_s10] sm:$0xff]  ;;  %v467_v24 = vld [vmem:[%s2346_s10 + $0x10] sm:$0xff] }
   0xa   :  { %v566_v25 = vld [vmem:[%s2348_s12 + $0x8] sm:$0xff]  ;;  %v565_v26 = vld [vmem:[%s2348_s12] sm:$0xff]  ;;  %v568_v27 = vld [vmem:[%s2348_s12 + $0x18] sm:$0xff] }
   0xb   :  { %v78_v0 = vld [vmem:[%s2364_s20 + $0x10] sm:$0xff]  ;;  %v76_v1 = vld [vmem:[%s2364_s20] sm:$0xff]  ;;  %v79_v4 = vld [vmem:[%s2364_s20 + $0x18] sm:$0xff] }
   0xc   :  { %v1749_v3 = vld [vmem:[%s2365_s23] sm:$0xff]   ;;  %92 = vperm.xlu1 %1748, %v78_v0   ;;  %82 = vperm.xlu0 %1747, %v76_v1   ;;  %v77_v5 = vld [vmem:[%s2364_s20 + $0x8] sm:$0xff]  ;;  %v1751_v7 = vld [vmem:[%s2365_s23 + $0x10] sm:$0xff]  }
   0xd   :  { %1631 = vmatprep.subr.bf16.mxu0 %v1749_v3  ;;  %v1750_v6 = vld [vmem:[%s2365_s23 + $0x8] sm:$0xff]   ;;  %v1753_v10 = vld [vmem:[%s2366_s24] sm:$0xff]   ;;  %v1752_v11 = vld [vmem:[%s2365_s23 + $0x18] sm:$0xff]  }
   0xe   :  { %1632 = vmatpush3.bf16.msra.mxu0 %v1749_v3  ;;  %1639 = vmatprep.mubr.msk.bf16.mxu0 %vm134_vm0, %v1753_v10  ;;  %v1754_v16 = vld [vmem:[%s2366_s24 + $0x8] sm:$0xff]   ;;  %v567_v28 = vld [vmem:[%s2348_s12 + $0x10] sm:$0xff]  ;;  %v664_v30 = vld [vmem:[%s2350_s14] sm:$0xff] }
   0xf   :  { %1633 = vmatprep.subr.bf16.mxu0 %v1750_v6  ;;  %v665_v29 = vld [vmem:[%s2350_s14 + $0x8] sm:$0xff] }
  0x10   :  { %97 = vperm.xlu1 %1748, %v79_v4   ;;  %87 = vperm.xlu0 %1747, %v77_v5  }
  0x12   :  { %1634 = vmatpush3.bf16.msra.mxu0 %v1750_v6 }
  0x13   :  { %1635 = vmatprep.subr.bf16.mxu0 %v1751_v7 }
  0x14   :  { %211 = vperm.xlu1 %1748, %v201_v8   ;;  %206 = vperm.xlu0 %1747, %v200_v9  }
  0x16   :  { %1636 = vmatpush3.bf16.msra.mxu0 %v1751_v7 }
  0x17   :  { %1637 = vmatprep.subr.bf16.mxu0 %v1752_v11 }
  0x18   :  { %221 = vperm.xlu1 %1748, %v203_v12   ;;  %216 = vperm.xlu0 %1747, %v202_v13  }
  0x1a   :  { %1638 = vmatpush3.bf16.msra.mxu0 %v1752_v11 }
  0x1c   :  { %311 = vperm.xlu1 %1748, %v301_v14   ;;  %306 = vperm.xlu0 %1747, %v300_v15  }
  0x1d   :  { %1640 = vmatmul.mubr.msk.bf16.vlgmr.msra.gmra.mrb[0].mxu0 %vm134_vm0, %v1754_v16 }
  0x20   :  { %321 = vperm.xlu1 %1748, %v303_v17   ;;  %316 = vperm.xlu0 %1747, %v302_v18  }
  0x24   :  { %406 = vperm.xlu1 %1748, %v398_v19   ;;  %401 = vperm.xlu0 %1747, %v397_v20  }
  0x28   :  { %476 = vperm.xlu1 %1748, %v466_v21   ;;  %471 = vperm.xlu0 %1747, %v465_v22  }
  0x2c   :  { %486 = vperm.xlu1 %1748, %v468_v23   ;;  %481 = vperm.xlu0 %1747, %v467_v24  }
  0x30   :  { %576 = vperm.xlu1 %1748, %v566_v25   ;;  %571 = vperm.xlu0 %1747, %v565_v26  }
  0x34   :  { %586 = vperm.xlu1 %1748, %v568_v27   ;;  %581 = vperm.xlu0 %1747, %v567_v28  }
  0x35   :  { %24 = vsyncpa [#allocation3], 0  ;;  %v667_v31 = vld [vmem:[%s2350_s14 + $0x18] sm:$0xff]  ;;  %v666_v32 = vld [vmem:[%s2350_s14 + $0x10] sm:$0xff]  ;;  %s2367_s23 = sld [smem:[#allocation8_spill]]  ;;  %vm234_vm1 = vcmask 261120  }
  0x36   :  { %v768_v33 = vld [vmem:[%s2352_s16 + $0x8] sm:$0xff]  ;;  %v767_v34 = vld [vmem:[%s2352_s16] sm:$0xff]  ;;  %v770_v35 = vld [vmem:[%s2352_s16 + $0x18] sm:$0xff]  ;;  %vm1888_vm2 = vmmov 0   ;;  %vm499_vm3 = vcmask 130048  }
  0x37   :  { %v769_v36 = vld [vmem:[%s2352_s16 + $0x10] sm:$0xff]  ;;  %v772_v37 = vld [vmem:[%s2352_s16 + $0x28] sm:$0xff]  ;;  %v771_v38 = vld [vmem:[%s2352_s16 + $0x20] sm:$0xff] }
  0x38   :  { %675 = vperm.xlu1 %1748, %v665_v29   ;;  %670 = vperm.xlu0 %1747, %v664_v30   ;;  %v774_v39 = vld [vmem:[%s2352_s16 + $0x38] sm:$0xff]  ;;  %v773_v40 = vld [vmem:[%s2352_s16 + $0x30] sm:$0xff]  ;;  %v949_v41 = vld [vmem:[%s2354_s18 + $0x8] sm:$0xff] }
  0x39   :  { %v948_v42 = vld [vmem:[%s2354_s18] sm:$0xff]  ;;  %v951_v43 = vld [vmem:[%s2354_s18 + $0x18] sm:$0xff]  ;;  %v950_v44 = vld [vmem:[%s2354_s18 + $0x10] sm:$0xff] }
  0x3a   :  { %v953_v45 = vld [vmem:[%s2354_s18 + $0x28] sm:$0xff]  ;;  %v952_v46 = vld [vmem:[%s2354_s18 + $0x20] sm:$0xff]  ;;  %v955_v47 = vld [vmem:[%s2354_s18 + $0x38] sm:$0xff] }
  0x3b   :  { %v954_v48 = vld [vmem:[%s2354_s18 + $0x30] sm:$0xff]  ;;  %v965_v49 = vld [vmem:[%s2354_s18 + $0x88] sm:$0xff]  ;;  %v964_v50 = vld [vmem:[%s2354_s18 + $0x80] sm:$0xff] }
  0x3c   :  { %685 = vperm.xlu1 %1748, %v667_v31   ;;  %680 = vperm.xlu0 %1747, %v666_v32   ;;  %v967_v51 = vld [vmem:[%s2354_s18 + $0x98] sm:$0xff]  ;;  %v966_v52 = vld [vmem:[%s2354_s18 + $0x90] sm:$0xff]  ;;  %v969_v53 = vld [vmem:[%s2354_s18 + $0xa8] sm:$0xff] }
  0x3d   :  { %v968_v54 = vld [vmem:[%s2354_s18 + $0xa0] sm:$0xff]  ;;  %v971_v55 = vld [vmem:[%s2354_s18 + $0xb8] sm:$0xff]  ;;  %v970_v56 = vld [vmem:[%s2354_s18 + $0xb0] sm:$0xff] }
  0x3e   :  { %v957_v57 = vld [vmem:[%s2354_s18 + $0x48] sm:$0xff]  ;;  %v956_v58 = vld [vmem:[%s2354_s18 + $0x40] sm:$0xff]  ;;  %v959_v59 = vld [vmem:[%s2354_s18 + $0x58] sm:$0xff] }
  0x3f   :  { %v958_v60 = vld [vmem:[%s2354_s18 + $0x50] sm:$0xff]  ;;  %v961_v61 = vld [vmem:[%s2354_s18 + $0x68] sm:$0xff]  ;;  %v960_v62 = vld [vmem:[%s2354_s18 + $0x60] sm:$0xff] }
  0x40   :  { %782 = vperm.xlu1 %1748, %v768_v33   ;;  %777 = vperm.xlu0 %1747, %v767_v34   ;;  %v963_v63 = vld [vmem:[%s2354_s18 + $0x78] sm:$0xff]  ;;  %v962_v0 = vld [vmem:[%s2354_s18 + $0x70] sm:$0xff]  ;;  %v1755_v1 = vld [vmem:[%s2367_s23] sm:$0xff]  }
  0x41   :  { %1647 = vmatprep.mubr.msk.bf16.mxu1 %vm234_vm1, %v1755_v1  ;;  %v1756_v20 = vld [vmem:[%s2367_s23 + $0x8] sm:$0xff]   ;;  %v1757_v21 = vld [vmem:[%s2341_s5] sm:$0xff]  }
  0x44   :  { %792 = vperm.xlu1 %1748, %v770_v35   ;;  %787 = vperm.xlu0 %1747, %v769_v36  }
  0x48   :  { %802 = vperm.xlu1 %1748, %v772_v37   ;;  %797 = vperm.xlu0 %1747, %v771_v38  }
  0x4c   :  { %812 = vperm.xlu1 %1748, %v774_v39   ;;  %807 = vperm.xlu0 %1747, %v773_v40   ;;  %v1758_v40 = vld [vmem:[%s2341_s5 + $0x8] sm:$0xff]  }
  0x50   :  { %979 = vperm.xlu1 %1748, %v949_v41   ;;  %974 = vperm.xlu0 %1747, %v948_v42   ;;  %v1887_v41 = vmov 0.0  }
  0x51   :  { %1659 = vmatprep.subr.bf16.mxu0 %v1887_v41  ;;  %1663 = vmatprep.mubr.msk.bf16.mxu0 %vm1888_vm2, %v1887_v41 }
  0x54   :  { %989 = vperm.xlu1 %1748, %v951_v43   ;;  %984 = vperm.xlu0 %1747, %v950_v44  }
  0x58   :  { %999 = vperm.xlu1 %1748, %v953_v45   ;;  %994 = vperm.xlu0 %1747, %v952_v46  }
  0x5c   :  { %1009 = vperm.xlu1 %1748, %v955_v47   ;;  %1004 = vperm.xlu0 %1747, %v954_v48  }
  0x60   :  { %1059 = vperm.xlu1 %1748, %v965_v49   ;;  %1054 = vperm.xlu0 %1747, %v964_v50  }
  0x64   :  { %1069 = vperm.xlu1 %1748, %v967_v51   ;;  %1064 = vperm.xlu0 %1747, %v966_v52  }
  0x68   :  { %1079 = vperm.xlu1 %1748, %v969_v53   ;;  %1074 = vperm.xlu0 %1747, %v968_v54  }
  0x6c   :  { %1089 = vperm.xlu1 %1748, %v971_v55   ;;  %1084 = vperm.xlu0 %1747, %v970_v56  }
  0x70   :  { %1019 = vperm.xlu1 %1748, %v957_v57   ;;  %1014 = vperm.xlu0 %1747, %v956_v58  }
  0x74   :  { %1029 = vperm.xlu1 %1748, %v959_v59   ;;  %1024 = vperm.xlu0 %1747, %v958_v60   ;;  %v1759_v60 = vld [vmem:[%s2343_s7] sm:$0xff]  }
  0x78   :  { %1039 = vperm.xlu1 %1748, %v961_v61   ;;  %1034 = vperm.xlu0 %1747, %v960_v62   ;;  %v1760_v61 = vld [vmem:[%s2345_s9] sm:$0xff]  }
  0x7c   :  { %1049 = vperm.xlu1 %1748, %v963_v63   ;;  %1044 = vperm.xlu0 %1747, %v962_v0  }
  0x8b   :  { %v93_v2 = vpop.permute.xlu1 %92  ;;  %v83_v3 = vpop.permute.xlu0 %82 }
  0x8f   :  { %v98_v7 = vpop.permute.xlu1 %97  ;;  %v88_v11 = vpop.permute.xlu0 %87 }
  0x93   :  { %v207_v22 = vpop.permute.xlu0 %206  ;;  %v212_v23 = vpop.permute.xlu1 %211 }
  0x97   :  { %v217_v24 = vpop.permute.xlu0 %216  ;;  %v222_v28 = vpop.permute.xlu1 %221 }
  0x9b   :  { %v307_v42 = vpop.permute.xlu0 %306  ;;  %v312_v43 = vpop.permute.xlu1 %311 }
  0x9f   :  { %v317_v44 = vpop.permute.xlu0 %316  ;;  %v322_v48 = vpop.permute.xlu1 %321 }
  0xa3   :  { %v402_v62 = vpop.permute.xlu0 %401 }
  0xf0   :  { %v1641_v4 = vpop.f32.mrb[0].mxu0 }
  0xf1   :  { %v184_v5 = vadd.f32 %v1641_v4, %v93_v2  ;;  %v175_v6 = vpop.f32.mrb[1].mxu0  ;;  %v407_v2 = vpop.permute.xlu1 %406 }
  0xf2   :  { %v1642_v8 = vpop.f32.mrb[2].mxu0  ;;  %v176_v9 = vadd.f32 %v175_v6, %v83_v3 }
  0xf3   :  { %v187_v10 = vadd.f32 %v1642_v8, %v98_v7  ;;  %v178_v12 = vpop.f32.mrb[3].mxu0  ;;  %v192_v13 = vmax.f32 %v184_v5, 0.0 }
  0xf4   :  { %v179_v15 = vadd.f32 %v178_v12, %v88_v11  ;;  %v190_v16 = vmax.f32 %v176_v9, 0.0  ;;  %v1761_v9 = vld [vmem:[%s2345_s9 + $0x8] sm:$0xff]   ;;  %v472_v11 = vpop.permute.xlu0 %471 }
  0xf5   :  { %v193_v14 = vmax.f32 %v187_v10, 0.0  ;;  %v1762_v10 = vld [vmem:[%s2347_s11] sm:$0xff]   ;;  %v477_v12 = vpop.permute.xlu1 %476 }
  0xf6   :  { %v191_v18 = vmax.f32 %v179_v15, 0.0 }
  0xf7   :  { %v195_v17 = vpack.c.bf16 %v193_v14, %v192_v13 }
  0xf8   :  { %v194_v19 = vpack.c.bf16 %v191_v18, %v190_v16  ;;  %v482_v13 = vpop.permute.xlu0 %481 }
  0xfa   :  { %1643 = vmatprep.subr.bf16.mxu1 %v194_v19 }
  0xfb   :  { %1644 = vmatpush3.bf16.msra.mxu1 %v194_v19 }
  0xfc   :  { %1645 = vmatprep.subr.bf16.mxu1 %v195_v17 }
  0xff   :  { %1646 = vmatpush3.bf16.msra.mxu1 %v195_v17  ;;  %v487_v17 = vpop.permute.xlu1 %486 }
 0x102   :  { %1648 = vmatmul.mubr.msk.bf16.vlgmr.msra.gmra.mrb[0].mxu1 %vm234_vm1, %v1756_v20 }
 0x103   :  { %1655 = vmatprep.mubr.msk.bf16.mxu1 %vm234_vm1, %v1757_v21 }
 0x1d5   :  { %v1649_v25 = vpop.f32.mrb[0].mxu1 }
 0x1d6   :  { %v284_v26 = vadd.f32 %v1649_v25, %v217_v24  ;;  %v275_v27 = vpop.f32.mrb[1].mxu1 }
 0x1d7   :  { %v276_v29 = vadd.f32 %v275_v27, %v207_v22  ;;  %v1650_v30 = vpop.f32.mrb[2].mxu1 }
 0x1d8   :  { %v287_v31 = vadd.f32 %v1650_v30, %v222_v28  ;;  %v278_v32 = vpop.f32.mrb[3].mxu1  ;;  %v292_v34 = vmax.f32 %v284_v26, 0.0  ;;  %v1764_v30 = vld [vmem:[%s2349_s13] sm:$0xff]  }
 0x1d9   :  { %v279_v33 = vadd.f32 %v278_v32, %v212_v23  ;;  %v290_v36 = vmax.f32 %v276_v29, 0.0  ;;  %v1763_v29 = vld [vmem:[%s2347_s11 + $0x8] sm:$0xff]   ;;  %v577_v32 = vpop.permute.xlu1 %576 }
 0x1da   :  { %v293_v35 = vmax.f32 %v287_v31, 0.0  ;;  %v572_v31 = vpop.permute.xlu0 %571 }
 0x1db   :  { %v291_v37 = vmax.f32 %v279_v33, 0.0 }
 0x1dc   :  { %v295_v38 = vpack.c.bf16 %v293_v35, %v292_v34 }
 0x1dd   :  { %v294_v39 = vpack.c.bf16 %v291_v37, %v290_v36  ;;  %v587_v37 = vpop.permute.xlu1 %586 }
 0x1de   :  { %v582_v33 = vpop.permute.xlu0 %581 }
 0x1df   :  { %1651 = vmatprep.subr.bf16.mxu1 %v294_v39 }
 0x1e0   :  { %1652 = vmatpush3.bf16.msra.mxu1 %v294_v39 }
 0x1e1   :  { %1653 = vmatprep.subr.bf16.mxu1 %v295_v38 }
 0x1e4   :  { %1654 = vmatpush3.bf16.msra.mxu1 %v295_v38 }
 0x1e7   :  { %1656 = vmatmul.mubr.msk.bf16.vlgmr.msra.gmra.mrb[4].mxu1 %vm234_vm1, %v1758_v40 }
 0x1e8   :  { %1669 = vmatprep.mubr.msk.bf16.mxu1 %vm499_vm3, %v1760_v61 }
 0x2ba   :  { %v1657_v45 = vpop.f32.mrb[4].mxu1 }
 0x2bb   :  { %v383_v46 = vadd.f32 %v1657_v45, %v317_v44  ;;  %v374_v47 = vpop.f32.mrb[5].mxu1 }
 0x2bc   :  { %v375_v49 = vadd.f32 %v374_v47, %v307_v42  ;;  %v1658_v50 = vpop.f32.mrb[6].mxu1 }
 0x2bd   :  { %v386_v51 = vadd.f32 %v1658_v50, %v322_v48  ;;  %v377_v52 = vpop.f32.mrb[7].mxu1  ;;  %v391_v54 = vmax.f32 %v383_v46, 0.0  ;;  %v1766_v50 = vld [vmem:[%s2351_s15] sm:$0xff]  }
 0x2be   :  { %v378_v53 = vadd.f32 %v377_v52, %v312_v43  ;;  %v389_v56 = vmax.f32 %v375_v49, 0.0  ;;  %v1765_v49 = vld [vmem:[%s2349_s13 + $0x8] sm:$0xff]   ;;  %v676_v52 = vpop.permute.xlu1 %675 }
 0x2bf   :  { %v392_v55 = vmax.f32 %v386_v51, 0.0  ;;  %v671_v51 = vpop.permute.xlu0 %670 }
 0x2c0   :  { %v390_v57 = vmax.f32 %v378_v53, 0.0 }
 0x2c1   :  { %v394_v58 = vpack.c.bf16 %v392_v55, %v391_v54 }
 0x2c2   :  { %v393_v59 = vpack.c.bf16 %v390_v57, %v389_v56  ;;  %v686_v57 = vpop.permute.xlu1 %685 }
 0x2c3   :  { %v681_v53 = vpop.permute.xlu0 %680 }
 0x2c4   :  { %1660 = vmatpush3.bf16.msra.mxu0 %v393_v59 }
 0x2c5   :  { %1661 = vmatprep.subr.bf16.mxu0 %v1887_v41 }
 0x2c8   :  { %1662 = vmatpush3.bf16.msra.mxu0 %v394_v58 }
 0x2cb   :  { %1664 = vmatmul.mubr.msk.bf16.vlgmr.msra.gmra.mrb[4].mxu0 %vm234_vm1, %v1759_v60 }
 0x2cc   :  { %1677 = vmatprep.mubr.msk.bf16.mxu0 %vm234_vm1, %v1762_v10  ;;  %v778_v10 = vpop.permute.xlu0 %777 }
 0x39e   :  { %v451_v63 = vpop.f32.mrb[4].mxu0 }
 0x39f   :  { %v452_v0 = vadd.f32 %v451_v63, %v402_v62  ;;  %v1665_v1 = vpop.f32.mrb[5].mxu0 }
 0x3a0   :  { %v454_v3 = vpop.f32.mrb[6].mxu0 }
 0x3a1   :  { %v458_v4 = vmax.f32 %v452_v0, 0.0  ;;  %v455_v5 = vadd.f32 %v454_v3, %v407_v2  ;;  %v1666_v6 = vpop.f32.mrb[7].mxu0 }
 0x3a2   :  { %v1768_v6 = vld [vmem:[%s2351_s15 + $0x10] sm:$0xff]  }
 0x3a3   :  { %1485 = vst [vmem:[#allocation2 + $0xc0] sm:$0xff] %v458_v4  ;;  %v459_v7 = vmax.f32 %v455_v5, 0.0  ;;  %v1767_v5 = vld [vmem:[%s2351_s15 + $0x8] sm:$0xff]  }
 0x3a5   :  { %v460_v8 = vpack.c.bf16 %v459_v7, %v458_v4  ;;  %1486 = vst [vmem:[#allocation2 + $0xc8] sm:$0xff] %v459_v7  ;;  %v1769_v7 = vld [vmem:[%s2351_s15 + $0x18] sm:$0xff]  }
 0x3a7   :  { %1667 = vmatprep.subr.bf16.mxu1 %v460_v8 }
 0x3a8   :  { %1668 = vmatpush3.bf16.msra.mxu1 %v460_v8  ;;  %v1770_v8 = vld [vmem:[%s2353_s17] sm:$0xff]  }
 0x3ab   :  { %1670 = vmatmul.mubr.msk.bf16.vlgmr.msra.gmra.mrb[8].mxu1 %vm499_vm3, %v1761_v9  ;;  %v1771_v9 = vld [vmem:[%s2353_s17 + $0x20] sm:$0xff]  }
 0x3ac   :  { %1685 = vmatprep.mubr.msk.bf16.mxu1 %vm234_vm1, %v1764_v30 }
 0x47e   :  { %v1671_v14 = vpop.f32.mrb[8].mxu1 }
 0x47f   :  { %v549_v15 = vadd.f32 %v1671_v14, %v482_v13  ;;  %v540_v16 = vpop.f32.mrb[9].mxu1 }
 0x480   :  { %v541_v18 = vadd.f32 %v540_v16, %v472_v11  ;;  %v1672_v19 = vpop.f32.mrb[10].mxu1  ;;  %v783_v11 = vpop.permute.xlu1 %782 }
 0x481   :  { %v552_v20 = vadd.f32 %v1672_v19, %v487_v17  ;;  %v543_v21 = vpop.f32.mrb[11].mxu1  ;;  %v557_v23 = vmax.f32 %v549_v15, 0.0 }
 0x482   :  { %v544_v22 = vadd.f32 %v543_v21, %v477_v12  ;;  %v555_v25 = vmax.f32 %v541_v18, 0.0  ;;  %v788_v12 = vpop.permute.xlu0 %787 }
 0x483   :  { %v558_v24 = vmax.f32 %v552_v20, 0.0 }
 0x484   :  { %v556_v26 = vmax.f32 %v544_v22, 0.0  ;;  %v793_v13 = vpop.permute.xlu1 %792 }
 0x485   :  { %v560_v27 = vpack.c.bf16 %v558_v24, %v557_v23 }
 0x486   :  { %v559_v28 = vpack.c.bf16 %v556_v26, %v555_v25  ;;  %v798_v17 = vpop.permute.xlu0 %797 }
 0x488   :  { %1673 = vmatprep.subr.bf16.mxu0 %v559_v28  ;;  %v803_v22 = vpop.permute.xlu1 %802 }
 0x489   :  { %1674 = vmatpush3.bf16.msra.mxu0 %v559_v28 }
 0x48a   :  { %1675 = vmatprep.subr.bf16.mxu0 %v560_v27 }
 0x48d   :  { %1676 = vmatpush3.bf16.msra.mxu0 %v560_v27 }
 0x490   :  { %1678 = vmatmul.mubr.msk.bf16.vlgmr.msra.gmra.mrb[8].mxu0 %vm234_vm1, %v1763_v29  ;;  %v808_v29 = vpop.permute.xlu0 %807 }
 0x491   :  { %1693 = vmatprep.mubr.msk.bf16.mxu0 %vm234_vm1, %v1766_v50  ;;  %v1776_v50 = vld [vmem:[%s2353_s17 + $0x18] sm:$0xff]  }
 0x563   :  { %v1679_v34 = vpop.f32.mrb[8].mxu0 }
 0x564   :  { %v648_v35 = vadd.f32 %v1679_v34, %v582_v33  ;;  %v639_v36 = vpop.f32.mrb[9].mxu0  ;;  %v813_v34 = vpop.permute.xlu1 %812 }
 0x565   :  { %v640_v38 = vadd.f32 %v639_v36, %v572_v31  ;;  %v1680_v39 = vpop.f32.mrb[10].mxu0 }
 0x566   :  { %v651_v40 = vadd.f32 %v1680_v39, %v587_v37  ;;  %v642_v41 = vpop.f32.mrb[11].mxu0  ;;  %v656_v43 = vmax.f32 %v648_v35, 0.0 }
 0x567   :  { %v643_v42 = vadd.f32 %v642_v41, %v577_v32  ;;  %v654_v45 = vmax.f32 %v640_v38, 0.0 }
 0x568   :  { %v657_v44 = vmax.f32 %v651_v40, 0.0 }
 0x569   :  { %v655_v46 = vmax.f32 %v643_v42, 0.0 }
 0x56a   :  { %v659_v47 = vpack.c.bf16 %v657_v44, %v656_v43 }
 0x56b   :  { %v658_v48 = vpack.c.bf16 %v655_v46, %v654_v45  ;;  %v1772_v46 = vld [vmem:[%s2353_s17 + $0x8] sm:$0xff]  }
 0x56d   :  { %1681 = vmatprep.subr.bf16.mxu1 %v658_v48 }
 0x56e   :  { %1682 = vmatpush3.bf16.msra.mxu1 %v658_v48  ;;  %v1774_v48 = vld [vmem:[%s2353_s17 + $0x10] sm:$0xff]  }
 0x56f   :  { %1683 = vmatprep.subr.bf16.mxu1 %v659_v47 }
 0x572   :  { %1684 = vmatpush3.bf16.msra.mxu1 %v659_v47  ;;  %v1773_v47 = vld [vmem:[%s2353_s17 + $0x28] sm:$0xff]  }
 0x575   :  { %1686 = vmatmul.mubr.msk.bf16.vlgmr.msra.gmra.mrb[12].mxu1 %vm234_vm1, %v1765_v49  ;;  %v1775_v49 = vld [vmem:[%s2353_s17 + $0x30] sm:$0xff]  }
 0x576   :  { %1717 = vmatprep.mubr.msk.bf16.mxu1 %vm134_vm0, %v1771_v9 }
 0x648   :  { %v1687_v54 = vpop.f32.mrb[12].mxu1 }
 0x649   :  { %v747_v55 = vadd.f32 %v1687_v54, %v681_v53  ;;  %v738_v56 = vpop.f32.mrb[13].mxu1  ;;  %v1779_v53 = vld [vmem:[%s2353_s17 + $0x48] sm:$0xff]   ;;  %v1780_v54 = vld [vmem:[%s2353_s17 + $0x50] sm:$0xff]  }
 0x64a   :  { %v739_v58 = vadd.f32 %v738_v56, %v671_v51  ;;  %v1688_v59 = vpop.f32.mrb[14].mxu1  ;;  %v1777_v51 = vld [vmem:[%s2353_s17 + $0x38] sm:$0xff]   ;;  %v980_v56 = vpop.permute.xlu1 %979 }
 0x64b   :  { %v750_v60 = vadd.f32 %v1688_v59, %v686_v57  ;;  %v741_v61 = vpop.f32.mrb[15].mxu1  ;;  %v755_v63 = vmax.f32 %v747_v55, 0.0  ;;  %v1781_v55 = vld [vmem:[%s2353_s17 + $0x58] sm:$0xff]   ;;  %v975_v57 = vpop.permute.xlu0 %974 }
 0x64c   :  { %v742_v62 = vadd.f32 %v741_v61, %v676_v52  ;;  %v753_v1 = vmax.f32 %v739_v58, 0.0  ;;  %v1778_v52 = vld [vmem:[%s2353_s17 + $0x40] sm:$0xff]   ;;  %s1889_s17 = smov [#allocation2]  }
 0x64d   :  { %v756_v0 = vmax.f32 %v750_v60, 0.0  ;;  %s1492_s0 = sshll.u32 %s1889_s17, 4  ;;  %s1493_s0 = int_to_ptr.vmem [resolvable:$true] %s1492_s0 }
 0x64e   :  { %v754_v2 = vmax.f32 %v742_v62, 0.0  ;;  %v990_v58 = vpop.permute.xlu1 %989  ;;  %s1862_s12 = scalar_lea.vmem %s1493_s0, 3328  ;;  %p1867_p1 = scmp.lt.s32.totalorder %s1493_s0, %s1493_s0 }
 0x64f   :  { %v758_v3 = vpack.c.bf16 %v756_v0, %v755_v63  ;;  %v985_v59 = vpop.permute.xlu0 %984  ;;  %p1863_p0 = scmp.ne.s32.totalorder %s1493_s0, %s1862_s12  ;;  %p1868_p2 = scmp.lt.s32.totalorder %s1862_s12, %s1862_s12 }
 0x650   :  { %v757_v4 = vpack.c.bf16 %v754_v2, %v753_v1 }
 0x651   :  { %p1869_p3 = por %p1868_p2, %p1867_p1 }
 0x652   :  { %1689 = vmatprep.subr.bf16.mxu0 %v757_v4  ;;  %v2294_v60 = vpop.permute.xlu1 %999 }
 0x653   :  { %1690 = vmatpush3.bf16.msra.mxu0 %v757_v4  ;;  %v995_v61 = vpop.permute.xlu0 %994  ;;  %p1870_p4 = pnand %p1869_p3, %p1863_p0 }
 0x654   :  { %1691 = vmatprep.subr.bf16.mxu0 %v758_v3 }
 0x656   :  { %v2296_v62 = vpop.permute.xlu1 %1009 }
 0x657   :  { %1692 = vmatpush3.bf16.msra.mxu0 %v758_v3  ;;  %v1005_v63 = vpop.permute.xlu0 %1004 }
 0x65a   :  { %1694 = vmatmul.mubr.msk.bf16.vlgmr.msra.gmra.mrb[12].mxu0 %vm234_vm1, %v1767_v5  ;;  %v2298_v0 = vpop.permute.xlu1 %1059 }
 0x65b   :  { %1697 = vmatprep.mubr.msk.bf16.mxu0 %vm234_vm1, %v1768_v6  ;;  %v2300_v1 = vpop.permute.xlu0 %1054 }
 0x65e   :  { %v2302_v2 = vpop.permute.xlu1 %1069 }
 0x65f   :  { %v2304_v3 = vpop.permute.xlu0 %1064 }
 0x662   :  { %1698 = vmatmul.mubr.msk.bf16.gmra.mrb[16].mxu0 %vm234_vm1, %v1769_v7  ;;  %v2306_v4 = vpop.permute.xlu1 %1079 }
 0x663   :  { %1709 = vmatprep.mubr.msk.bf16.mxu0 %vm134_vm0, %v1770_v8  ;;  %v2308_v5 = vpop.permute.xlu0 %1074 }
 0x666   :  { %v2310_v6 = vpop.permute.xlu1 %1089 }
 0x667   :  { %v2312_v7 = vpop.permute.xlu0 %1084 }
 0x66a   :  { %v1020_v8 = vpop.permute.xlu1 %1019 }
 0x66b   :  { %v1015_v9 = vpop.permute.xlu0 %1014 }
 0x72d   :  { %v1695_v14 = vpop.f32.mrb[12].mxu0 }
 0x72e   :  { %v890_v15 = vadd.f32 %v1695_v14, %v788_v12  ;;  %v881_v16 = vpop.f32.mrb[13].mxu0 }
 0x72f   :  { %v882_v18 = vadd.f32 %v881_v16, %v778_v10  ;;  %v1696_v19 = vpop.f32.mrb[14].mxu0  ;;  %v1030_v10 = vpop.permute.xlu1 %1029 }
 0x730   :  { %v893_v20 = vadd.f32 %v1696_v19, %v793_v13  ;;  %v884_v21 = vpop.f32.mrb[15].mxu0  ;;  %v914_v24 = vmax.f32 %v890_v15, 0.0 }
 0x731   :  { %v885_v23 = vadd.f32 %v884_v21, %v783_v11  ;;  %v912_v26 = vmax.f32 %v882_v18, 0.0  ;;  %v1025_v11 = vpop.permute.xlu0 %1024 }
 0x732   :  { %v915_v25 = vmax.f32 %v893_v20, 0.0 }
 0x733   :  { %v913_v27 = vmax.f32 %v885_v23, 0.0  ;;  %v1040_v12 = vpop.permute.xlu1 %1039 }
 0x734   :  { %v921_v28 = vpack.c.bf16 %v915_v25, %v914_v24 }
 0x735   :  { %v920_v30 = vpack.c.bf16 %v913_v27, %v912_v26  ;;  %v1699_v31 = vpop.f32.mrb[16].mxu0  ;;  %v1035_v13 = vpop.permute.xlu0 %1034 }
 0x736   :  { %v906_v32 = vadd.f32 %v1699_v31, %v808_v29  ;;  %v897_v33 = vpop.f32.mrb[17].mxu0 }
 0x737   :  { %v898_v35 = vadd.f32 %v897_v33, %v798_v17  ;;  %v1700_v36 = vpop.f32.mrb[18].mxu0  ;;  %1701 = vmatprep.subr.bf16.mxu0 %v920_v30  ;;  %1733 = vmatprep.subr.bf16.mxu1 %v920_v30 }
 0x738   :  { %v909_v37 = vadd.f32 %v1700_v36, %v813_v34  ;;  %v900_v38 = vpop.f32.mrb[19].mxu0  ;;  %1702 = vmatpush3.bf16.msra.mxu0 %v920_v30  ;;  %1737 = vmatpush3.bf16.msra.mxu1 %v920_v30  ;;  %v918_v40 = vmax.f32 %v906_v32, 0.0 }
 0x739   :  { %v901_v39 = vadd.f32 %v900_v38, %v803_v22  ;;  %1703 = vmatprep.subr.bf16.mxu0 %v921_v28  ;;  %1734 = vmatprep.subr.bf16.mxu1 %v921_v28  ;;  %v916_v42 = vmax.f32 %v898_v35, 0.0 }
 0x73a   :  { %v919_v41 = vmax.f32 %v909_v37, 0.0 }
 0x73b   :  { %v917_v43 = vmax.f32 %v901_v39, 0.0 }
 0x73c   :  { %v923_v44 = vpack.c.bf16 %v919_v41, %v918_v40  ;;  %1704 = vmatpush3.bf16.msra.mxu0 %v921_v28  ;;  %1738 = vmatpush3.bf16.msra.mxu1 %v921_v28  ;;  %v1050_v40 = vpop.permute.xlu1 %1049  ;;  %v1045_v41 = vpop.permute.xlu0 %1044 }
 0x73d   :  { %v922_v45 = vpack.c.bf16 %v917_v43, %v916_v42 }
 0x73f   :  { %1705 = vmatprep.subr.bf16.mxu0 %v922_v45  ;;  %1735 = vmatprep.subr.bf16.mxu1 %v922_v45 }
 0x740   :  { %1706 = vmatpush3.bf16.msra.mxu0 %v922_v45  ;;  %1739 = vmatpush3.bf16.msra.mxu1 %v922_v45 }
 0x741   :  { %1707 = vmatprep.subr.bf16.mxu0 %v923_v44  ;;  %1736 = vmatprep.subr.bf16.mxu1 %v923_v44 }
 0x744   :  { %1708 = vmatpush3.bf16.msra.mxu0 %v923_v44  ;;  %1740 = vmatpush3.bf16.msra.mxu1 %v923_v44 }
 0x747   :  { %1710 = vmatmul.mubr.msk.bf16.vlgmr.msra.gmra.mrb[20].mxu0 %vm134_vm0, %v1772_v46  ;;  %1718 = vmatmul.mubr.msk.bf16.vlgmr.msra.gmra.mrb[16].mxu1 %vm134_vm0, %v1773_v47 }
 0x748   :  { %1713 = vmatprep.mubr.msk.bf16.mxu0 %vm134_vm0, %v1774_v48  ;;  %1721 = vmatprep.mubr.msk.bf16.mxu1 %vm134_vm0, %v1775_v49 }
 0x74f   :  { %1714 = vmatmul.mubr.msk.bf16.gmra.mrb[24].mxu0 %vm134_vm0, %v1776_v50  ;;  %1722 = vmatmul.mubr.msk.bf16.gmra.mrb[20].mxu1 %vm134_vm0, %v1777_v51 }
 0x750   :  { %1725 = vmatprep.mubr.msk.bf16.mxu1 %vm134_vm0, %v1778_v52 }
 0x757   :  { %1726 = vmatmul.mubr.msk.bf16.gmra.mrb[24].mxu1 %vm134_vm0, %v1779_v53 }
 0x758   :  { %1729 = vmatprep.mubr.msk.bf16.mxu1 %vm134_vm0, %v1780_v54 }
 0x75f   :  { %1730 = vmatmul.mubr.msk.bf16.gmra.mrb[28].mxu1 %vm134_vm0, %v1781_v55 }
 0x81a   :  { %v1711_v14 = vpop.f32.mrb[20].mxu0  ;;  %v1719_v15 = vpop.f32.mrb[16].mxu1 }
 0x81b   :  { %v1231_v16 = vadd.f32 %v1711_v14, %v985_v59  ;;  %v1263_v17 = vadd.f32 %v1719_v15, %v1025_v11  ;;  %v1222_v18 = vpop.f32.mrb[21].mxu0  ;;  %v1254_v19 = vpop.f32.mrb[17].mxu1 }
 0x81c   :  { %v1223_v20 = vadd.f32 %v1222_v18, %v975_v57  ;;  %v1255_v21 = vadd.f32 %v1254_v19, %v1015_v9  ;;  %v1712_v22 = vpop.f32.mrb[22].mxu0  ;;  %v1720_v23 = vpop.f32.mrb[18].mxu1 }
 0x81d   :  { %v1567_v24 = vmul.f32 -1.442695, %v1231_v16  ;;  %v1415_v25 = vmax.f32 %v1263_v17, 0.0001  ;;  %v1234_v26 = vadd.f32 %v1712_v22, %v990_v58  ;;  %v1266_v27 = vadd.f32 %v1720_v23, %v1030_v10  ;;  %v1225_v28 = vpop.f32.mrb[23].mxu0  ;;  %v1257_v29 = vpop.f32.mrb[19].mxu1 }
 0x81e   :  { %v1565_v30 = vmul.f32 -1.442695, %v1223_v20  ;;  %v1413_v31 = vmax.f32 %v1255_v21, 0.0001  ;;  %v1226_v32 = vadd.f32 %v1225_v28, %v980_v56  ;;  %v1258_v33 = vadd.f32 %v1257_v29, %v1020_v8 }
 0x81f   :  { %1782 = vpow2.f32 %v1567_v24  ;;  %v1423_v34 = vmin.f32 %v1415_v25, 10000.0  ;;  %v1568_v35 = vmul.f32 -1.442695, %v1234_v26  ;;  %v1416_v36 = vmax.f32 %v1266_v27, 0.0001 }
 0x820   :  { %1784 = vpow2.f32 %v1565_v30  ;;  %v1421_v37 = vmin.f32 %v1413_v31, 10000.0  ;;  %v1566_v38 = vmul.f32 -1.442695, %v1226_v32  ;;  %v1414_v39 = vmax.f32 %v1258_v33, 0.0001 }
 0x821   :  { %1471 = vst [vmem:[#allocation2 + $0x50] sm:$0xff] %v1423_v34  ;;  %1786 = vpow2.f32 %v1568_v35  ;;  %v1424_v42 = vmin.f32 %v1416_v36, 10000.0 }
 0x822   :  { %1469 = vst [vmem:[#allocation2 + $0x40] sm:$0xff] %v1421_v37  ;;  %1788 = vpow2.f32 %v1566_v38  ;;  %v1422_v43 = vmin.f32 %v1414_v39, 10000.0  ;;  %v1715_v44 = vpop.f32.mrb[24].mxu0  ;;  %v1723_v45 = vpop.f32.mrb[20].mxu1 }
 0x823   :  { %1472 = vst [vmem:[#allocation2 + $0x58] sm:$0xff] %v1424_v42  ;;  %v1247_v46 = vadd.f32 %v1715_v44, %v1005_v63  ;;  %v1279_v47 = vadd.f32 %v1723_v45, %v1045_v41  ;;  %v1238_v48 = vpop.f32.mrb[25].mxu0  ;;  %v1270_v49 = vpop.f32.mrb[21].mxu1 }
 0x824   :  { %1470 = vst [vmem:[#allocation2 + $0x48] sm:$0xff] %v1422_v43  ;;  %v1239_v50 = vadd.f32 %v1238_v48, %v995_v61  ;;  %v1271_v51 = vadd.f32 %v1270_v49, %v1035_v13  ;;  %v1716_v52 = vpop.f32.mrb[26].mxu0  ;;  %v1724_v53 = vpop.f32.mrb[22].mxu1 }
 0x825   :  { %v1571_v54 = vmul.f32 -1.442695, %v1247_v46  ;;  %v1419_v55 = vmax.f32 %v1279_v47, 0.0001  ;;  %v1250_v56 = vadd.f32 %v1716_v52, %v2296_v62  ;;  %v1282_v57 = vadd.f32 %v1724_v53, %v1050_v40  ;;  %v1241_v58 = vpop.f32.mrb[27].mxu0  ;;  %v1273_v59 = vpop.f32.mrb[23].mxu1 }
 0x826   :  { %v1569_v8 = vmul.f32 -1.442695, %v1239_v50  ;;  %v1417_v9 = vmax.f32 %v1271_v51, 0.0001  ;;  %v1242_v10 = vadd.f32 %v1241_v58, %v2294_v60  ;;  %v1274_v63 = vadd.f32 %v1273_v59, %v1040_v12 }
 0x827   :  { %1790 = vpow2.f32 %v1571_v54  ;;  %v1427_v11 = vmin.f32 %v1419_v55, 10000.0  ;;  %v1572_v14 = vmul.f32 -1.442695, %v1250_v56  ;;  %v1420_v15 = vmax.f32 %v1282_v57, 0.0001 }
 0x828   :  { %1792 = vpow2.f32 %v1569_v8  ;;  %v1425_v61 = vmin.f32 %v1417_v9, 10000.0  ;;  %v1570_v13 = vmul.f32 -1.442695, %v1242_v10  ;;  %v1418_v16 = vmax.f32 %v1274_v63, 0.0001 }
 0x829   :  { %v1783_v17 = vpop.eup %1782  ;;  %1475 = vst [vmem:[#allocation2 + $0x70] sm:$0xff] %v1427_v11  ;;  %1794 = vpow2.f32 %v1572_v14  ;;  %v1428_v62 = vmin.f32 %v1420_v15, 10000.0 }
 0x82a   :  { %v1785_v18 = vpop.eup %1784  ;;  %v1343_v19 = vadd.f32 1.0, %v1783_v17  ;;  %1473 = vst [vmem:[#allocation2 + $0x60] sm:$0xff] %v1425_v61  ;;  %1796 = vpow2.f32 %v1570_v13  ;;  %v1426_v20 = vmin.f32 %v1418_v16, 10000.0  ;;  %v1727_v21 = vpop.f32.mrb[24].mxu1 }
 0x82b   :  { %v1787_v60 = vpop.eup %1786  ;;  %v1341_v12 = vadd.f32 1.0, %v1785_v18  ;;  %1476 = vst [vmem:[#allocation2 + $0x78] sm:$0xff] %v1428_v62  ;;  %v1295_v22 = vadd.f32 %v1727_v21, %v2304_v3  ;;  %v1286_v23 = vpop.f32.mrb[25].mxu1 }
 0x82c   :  { %v1789_v24 = vpop.eup %1788  ;;  %1798 = vrcp.f32 %v1343_v19  ;;  %v1344_v25 = vadd.f32 1.0, %v1787_v60  ;;  %1474 = vst [vmem:[#allocation2 + $0x68] sm:$0xff] %v1426_v20  ;;  %v1287_v26 = vadd.f32 %v1286_v23, %v2300_v1  ;;  %v1728_v27 = vpop.f32.mrb[26].mxu1 }
 0x82d   :  { %1800 = vrcp.f32 %v1341_v12  ;;  %v1342_v28 = vadd.f32 1.0, %v1789_v24  ;;  %v1433_v29 = vmul.f32 1.442695, %v1295_v22  ;;  %v1298_v30 = vadd.f32 %v1728_v27, %v2302_v2  ;;  %v1289_v31 = vpop.f32.mrb[27].mxu1 }
 0x82e   :  { %1802 = vrcp.f32 %v1344_v25  ;;  %v1429_v32 = vmul.f32 1.442695, %v1287_v26  ;;  %v1290_v33 = vadd.f32 %v1289_v31, %v2298_v0 }
 0x82f   :  { %1804 = vrcp.f32 %v1342_v28  ;;  %v1435_v3 = vmul.f32 1.442695, %v1298_v30 }
 0x830   :  { %1806 = vpow2.f32 %v1433_v29  ;;  %v1431_v34 = vmul.f32 1.442695, %v1290_v33 }
 0x831   :  { %v1791_v35 = vpop.eup %1790  ;;  %1808 = vpow2.f32 %v1429_v32 }
 0x832   :  { %v1793_v36 = vpop.eup %1792  ;;  %v1347_v37 = vadd.f32 1.0, %v1791_v35  ;;  %1810 = vpow2.f32 %v1435_v3  ;;  %v1731_v1 = vpop.f32.mrb[28].mxu1 }
 0x833   :  { %v1795_v38 = vpop.eup %1794  ;;  %v1345_v39 = vadd.f32 1.0, %v1793_v36  ;;  %1812 = vpow2.f32 %v1431_v34  ;;  %v1311_v2 = vadd.f32 %v1731_v1, %v2312_v7  ;;  %v1302_v40 = vpop.f32.mrb[29].mxu1 }
 0x834   :  { %v1797_v41 = vpop.eup %1796  ;;  %1814 = vrcp.f32 %v1347_v37  ;;  %v1348_v42 = vadd.f32 1.0, %v1795_v38  ;;  %v1732_v0 = vpop.f32.mrb[30].mxu1  ;;  %v1303_v45 = vadd.f32 %v1302_v40, %v2308_v5 }
 0x835   :  { %1816 = vrcp.f32 %v1345_v39  ;;  %v1346_v43 = vadd.f32 1.0, %v1797_v41  ;;  %v1441_v44 = vmul.f32 1.442695, %v1311_v2  ;;  %v1305_v46 = vpop.f32.mrb[31].mxu1  ;;  %v1314_v48 = vadd.f32 %v1732_v0, %v2310_v6 }
 0x836   :  { %v1799_v47 = vpop.eup %1798  ;;  %1818 = vrcp.f32 %v1348_v42  ;;  %v1306_v7 = vadd.f32 %v1305_v46, %v2306_v4  ;;  %v1437_v55 = vmul.f32 1.442695, %v1303_v45 }
 0x837   :  { %v1801_v49 = vpop.eup %1800  ;;  %v1575_v50 = vmul.f32 -1.442695, %v1799_v47  ;;  %1820 = vrcp.f32 %v1346_v43  ;;  %v1443_v57 = vmul.f32 1.442695, %v1314_v48 }
 0x838   :  { %v1803_v51 = vpop.eup %1802  ;;  %v1573_v52 = vmul.f32 -1.442695, %v1801_v49  ;;  %1822 = vpow2.f32 %v1441_v44  ;;  %v1439_v6 = vmul.f32 1.442695, %v1306_v7 }
 0x839   :  { %v1805_v53 = vpop.eup %1804  ;;  %1824 = vpow2.f32 %v1575_v50  ;;  %v1576_v54 = vmul.f32 -1.442695, %v1803_v51 }
 0x83a   :  { %v1807_v56 = vpop.eup %1806  ;;  %1826 = vpow2.f32 %v1573_v52  ;;  %v1574_v5 = vmul.f32 -1.442695, %v1805_v53 }
 0x83b   :  { %v1809_v58 = vpop.eup %1808  ;;  %1828 = vpow2.f32 %v1576_v54  ;;  %v1447_v59 = vmax.f32 %v1807_v56, 1e-05 }
 0x83c   :  { %v1811_v8 = vpop.eup %1810  ;;  %1830 = vpow2.f32 %v1574_v5  ;;  %v1445_v9 = vmax.f32 %v1809_v58, 1e-05 }
 0x83d   :  { %v1813_v10 = vpop.eup %1812  ;;  %v1455_v4 = vmin.f32 %v1447_v59, 1000000.0  ;;  %v1448_v63 = vmax.f32 %v1811_v8, 1e-05  ;;  %1832 = vpow2.f32 %v1437_v55 }
 0x83e   :  { %v1815_v11 = vpop.eup %1814  ;;  %v1453_v14 = vmin.f32 %v1445_v9, 1000000.0  ;;  %v1446_v15 = vmax.f32 %v1813_v10, 1e-05  ;;  %1834 = vpow2.f32 %v1443_v57 }
 0x83f   :  { %v1817_v61 = vpop.eup %1816  ;;  %v1579_v13 = vmul.f32 -1.442695, %v1815_v11  ;;  %1479 = vst [vmem:[#allocation2 + $0x90] sm:$0xff] %v1455_v4  ;;  %v1456_v16 = vmin.f32 %v1448_v63, 1000000.0  ;;  %1836 = vpow2.f32 %v1439_v6 }
 0x840   :  { %v1819_v17 = vpop.eup %1818  ;;  %v1577_v62 = vmul.f32 -1.442695, %v1817_v61  ;;  %1477 = vst [vmem:[#allocation2 + $0x80] sm:$0xff] %v1453_v14  ;;  %v1454_v18 = vmin.f32 %v1446_v15, 1000000.0 }
 0x841   :  { %v1821_v19 = vpop.eup %1820  ;;  %1838 = vpow2.f32 %v1579_v13  ;;  %v1580_v20 = vmul.f32 -1.442695, %v1819_v17  ;;  %1480 = vst [vmem:[#allocation2 + $0x98] sm:$0xff] %v1456_v16 }
 0x842   :  { %v1823_v21 = vpop.eup %1822  ;;  %1840 = vpow2.f32 %v1577_v62  ;;  %v1578_v60 = vmul.f32 -1.442695, %v1821_v19  ;;  %1478 = vst [vmem:[#allocation2 + $0x88] sm:$0xff] %v1454_v18 }
 0x843   :  { %v1825_v12 = vpop.eup %1824  ;;  %1842 = vpow2.f32 %v1580_v20  ;;  %v1451_v22 = vmax.f32 %v1823_v21, 1e-05 }
 0x844   :  { %v1827_v23 = vpop.eup %1826  ;;  %v1391_v24 = vadd.f32 1.0, %v1825_v12  ;;  %1844 = vpow2.f32 %v1578_v60 }
 0x845   :  { %v1829_v25 = vpop.eup %1828  ;;  %v1389_v26 = vadd.f32 1.0, %v1827_v23  ;;  %v1459_v27 = vmin.f32 %v1451_v22, 1000000.0 }
 0x846   :  { %v1831_v28 = vpop.eup %1830  ;;  %1846 = vrcp.f32 %v1391_v24  ;;  %v1392_v29 = vadd.f32 1.0, %v1829_v25 }
 0x847   :  { %v1833_v30 = vpop.eup %1832  ;;  %1848 = vrcp.f32 %v1389_v26  ;;  %v1390_v31 = vadd.f32 1.0, %v1831_v28  ;;  %1483 = vst [vmem:[#allocation2 + $0xb0] sm:$0xff] %v1459_v27 }
 0x848   :  { %v1835_v32 = vpop.eup %1834  ;;  %1850 = vrcp.f32 %v1392_v29  ;;  %v1449_v33 = vmax.f32 %v1833_v30, 1e-05 }
 0x849   :  { %v1837_v3 = vpop.eup %1836  ;;  %1852 = vrcp.f32 %v1390_v31  ;;  %v1452_v34 = vmax.f32 %v1835_v32, 1e-05 }
 0x84a   :  { %v1457_v35 = vmin.f32 %v1449_v33, 1000000.0  ;;  %v1450_v36 = vmax.f32 %v1837_v3, 1e-05 }
 0x84b   :  { %v1839_v37 = vpop.eup %1838  ;;  %v1460_v1 = vmin.f32 %v1452_v34, 1000000.0 }
 0x84c   :  { %v1841_v38 = vpop.eup %1840  ;;  %v1395_v39 = vadd.f32 1.0, %v1839_v37  ;;  %1481 = vst [vmem:[#allocation2 + $0xa0] sm:$0xff] %v1457_v35  ;;  %v1458_v2 = vmin.f32 %v1450_v36, 1000000.0 }
 0x84d   :  { %v1843_v40 = vpop.eup %1842  ;;  %v1393_v41 = vadd.f32 1.0, %v1841_v38  ;;  %1484 = vst [vmem:[#allocation2 + $0xb8] sm:$0xff] %v1460_v1 }
 0x84e   :  { %v1845_v42 = vpop.eup %1844  ;;  %1854 = vrcp.f32 %v1395_v39  ;;  %v1396_v0 = vadd.f32 1.0, %v1843_v40  ;;  %1482 = vst [vmem:[#allocation2 + $0xa8] sm:$0xff] %v1458_v2 }
 0x84f   :  { %1856 = vrcp.f32 %v1393_v41  ;;  %v1394_v43 = vadd.f32 1.0, %v1845_v42 }
 0x850   :  { %v1847_v44 = vpop.eup %1846  ;;  %1858 = vrcp.f32 %v1396_v0 }
 0x851   :  { %v1849_v45 = vpop.eup %1848  ;;  %1463 = vst [vmem:[#allocation2 + $0x10] sm:$0xff] %v1847_v44  ;;  %1860 = vrcp.f32 %v1394_v43 }
 0x852   :  { %v1851_v46 = vpop.eup %1850  ;;  %1461 = vst [vmem:[#allocation2] sm:$0xff] %v1849_v45 }
 0x853   :  { %v1853_v47 = vpop.eup %1852  ;;  %1464 = vst [vmem:[#allocation2 + $0x18] sm:$0xff] %v1851_v46 }
 0x854   :  { %1462 = vst [vmem:[#allocation2 + $0x8] sm:$0xff] %v1853_v47 }
 0x858   :  { %v1855_v48 = vpop.eup %1854 }
 0x859   :  { %v1857_v49 = vpop.eup %1856  ;;  %1467 = vst [vmem:[#allocation2 + $0x30] sm:$0xff] %v1855_v48 }
 0x85a   :  { %v1859_v50 = vpop.eup %1858  ;;  %1465 = vst [vmem:[#allocation2 + $0x20] sm:$0xff] %v1857_v49 }
 0x85b   :  { %v1861_v7 = vpop.eup %1860  ;;  %1468 = vst [vmem:[#allocation2 + $0x38] sm:$0xff] %v1859_v50 }
 0x85c   :  { %1466 = vst [vmem:[#allocation2 + $0x28] sm:$0xff] %v1861_v7 }
 0x85d   :  { %1873 = shalt.err (!%p1870_p4)
}
 0x85e   :  { %s1874_s23 = scalar_lea.hbm %s2355_s19, 3328 }
 0x85f   :  { %p1875_p5 = scmp.ne.s32.totalorder %s2355_s19, %s1874_s23  ;;  %p1878_p6 = scmp.lt.u32.totalorder %s1874_s23, %s2355_s19 }
 0x861   :  { %p1880_p7 = pnand %p1878_p6, %p1875_p5 }
 0x863   :  { %1883 = shalt.err (!%p1880_p7)
}
 0x864   :  { %s1890_s15 = smov 128   ;;  %s1891_s8 = smov 8  }
 0x865   :  { %1498 = dma.vmem_to_hbm [thread:$0]  %s1493_s0, 3328, %s2355_s19, [#allocation3], %s1890_s15, %s1890_s15, %s1891_s8  }
 0x866   :  { %1884 = dma.done.wait [#allocation3], 3328  }
 0x867   :  { %1885 = vsyncadd [#allocation3], 4294963968 }
 0x868   :  { %1502 = vsyncpa [#allocation3], 1 }

</bundles_post_ra>
